<compile_context>
chip_gen: v5e
topology: v5e:2x2
jax: 0.10.0
libtpu: 0.0.40
codegen_flags: <defaults>
</compile_context>

<pallas_src>
import functools

import jax
import jax.numpy as jnp
from jax.experimental import pallas as pl
from jax.experimental.pallas import tpu as pltpu


# ----------------------------------------------------------------------------
# Pallas kernels
# ----------------------------------------------------------------------------
def _matmul_bias_kernel(a_ref, b_ref, bias_ref, o_ref, *, act):
    """(M, K) @ (K, bn) + bias, optional ReLU.  MXU operands in bf16,
    accumulation and elementwise math in f32 (v5e-safe)."""
    a = a_ref[...].astype(jnp.bfloat16)
    b = b_ref[...].astype(jnp.bfloat16)
    y = jnp.dot(a, b, preferred_element_type=jnp.float32)
    y = y + bias_ref[...]
    if act == "relu":
        y = jnp.maximum(y, 0.0)
    o_ref[...] = y.astype(o_ref.dtype)


def matmul_bias_act(a, b, bias, act="none", out_dtype=jnp.float32, block_n=512):
    """Lane-dense matmul: a (M, K) @ b (K, N) + bias -> (M, N).

    bias is (M, 1) (per output row / channel) or (1, N) (per output column).
    The grid splits the N (lane) axis and is marked "parallel" so v7x can
    shard the blocks across its two TensorCores.
    """
    M, K = a.shape
    K2, N = b.shape
    assert K == K2 and N % 128 == 0
    bn = min(N, block_n)
    assert N % bn == 0
    if bias.shape[0] == 1:                       # (1, N) per-column bias
        bias_spec = pl.BlockSpec((1, bn), lambda j: (0, j))
    else:                                        # (M, 1) per-row bias
        bias_spec = pl.BlockSpec((M, 1), lambda j: (0, 0))
    return pl.pallas_call(
        functools.partial(_matmul_bias_kernel, act=act),
        out_shape=jax.ShapeDtypeStruct((M, N), out_dtype),
        grid_spec=pltpu.PrefetchScalarGridSpec(
            num_scalar_prefetch=0,
            grid=(N // bn,),
            in_specs=[
                pl.BlockSpec((M, K), lambda j: (0, 0)),    # weights resident
                pl.BlockSpec((K, bn), lambda j: (0, j)),   # stream N blocks
                bias_spec,
            ],
            out_specs=pl.BlockSpec((M, bn), lambda j: (0, j)),
        ),
        compiler_params=pltpu.CompilerParams(
            dimension_semantics=("parallel",),
            vmem_limit_bytes=32 * 1024 * 1024,
        ),
    )(a, b, bias)


def _lstm_seq_kernel(xg_ref, whh_ref, h0_ref, c0_ref,
                     h_out_ref, c_out_ref, h_s, c_s):
    """One LSTM step per grid iteration.  h/c live in VMEM scratch across the
    whole sequence, the per-gate recurrent weights (4, H, H) stay resident,
    and xg_ref is this timestep's (4, B, H) x-gate pre-activation tile (it
    already contains the folded FC projection and all biases).  The gate index
    sits on a non-lane axis, so no cross-lane slicing is needed."""
    t = pl.program_id(0)

    @pl.when(t == 0)
    def _():
        h_s[...] = h0_ref[...]
        c_s[...] = c0_ref[...]

    h = h_s[...]
    c = c_s[...]
    hb = h.astype(jnp.bfloat16)                      # bf16 only at the MXU
    gi = xg_ref[0] + jnp.dot(hb, whh_ref[0], preferred_element_type=jnp.float32)
    gf = xg_ref[1] + jnp.dot(hb, whh_ref[1], preferred_element_type=jnp.float32)
    gg = xg_ref[2] + jnp.dot(hb, whh_ref[2], preferred_element_type=jnp.float32)
    go = xg_ref[3] + jnp.dot(hb, whh_ref[3], preferred_element_type=jnp.float32)
    i_g = jax.nn.sigmoid(gi)                          # f32 gate math (v5e)
    f_g = jax.nn.sigmoid(gf)
    g_g = jnp.tanh(gg)
    o_g = jax.nn.sigmoid(go)
    c_new = f_g * c + i_g * g_g
    h_new = o_g * jnp.tanh(c_new)
    h_s[...] = h_new
    c_s[...] = c_new

    @pl.when(t == pl.num_programs(0) - 1)
    def _():
        h_out_ref[...] = h_new
        c_out_ref[...] = c_new


def lstm_sequence(xg, whh, h0, c0):
    """xg: (T, 4, B, H) f32 x-gate pre-activations, whh: (4, H, H) bf16,
    h0/c0: (B, H) f32  ->  final (h_T, c_T)."""
    T, G, B, Hd = xg.shape
    return pl.pallas_call(
        _lstm_seq_kernel,
        out_shape=(jax.ShapeDtypeStruct((B, Hd), jnp.float32),
                   jax.ShapeDtypeStruct((B, Hd), jnp.float32)),
        grid_spec=pltpu.PrefetchScalarGridSpec(
            num_scalar_prefetch=0,
            grid=(T,),
            in_specs=[
                pl.BlockSpec((None, G, B, Hd), lambda t: (t, 0, 0, 0)),
                pl.BlockSpec((G, Hd, Hd), lambda t: (0, 0, 0)),
                pl.BlockSpec((B, Hd), lambda t: (0, 0)),
                pl.BlockSpec((B, Hd), lambda t: (0, 0)),
            ],
            out_specs=(
                pl.BlockSpec((B, Hd), lambda t: (0, 0)),
                pl.BlockSpec((B, Hd), lambda t: (0, 0)),
            ),
            scratch_shapes=[pltpu.VMEM((B, Hd), jnp.float32),
                            pltpu.VMEM((B, Hd), jnp.float32)],
        ),
        compiler_params=pltpu.CompilerParams(
            dimension_semantics=("arbitrary",),     # sequential recurrence
            vmem_limit_bytes=32 * 1024 * 1024,
        ),
    )(xg, whh, h0, c0)


# ----------------------------------------------------------------------------
# Glue (XLA): im2col, parameter preparation
# ----------------------------------------------------------------------------
def _im2col(x_nhwc, kh, kw, stride, pad):
    """(N, H, W, C) -> (N, Ho, Wo, kh*kw*C) patches.  Pure data movement."""
    x = jnp.pad(x_nhwc, ((0, 0), (pad, pad), (pad, pad), (0, 0)))
    N, Hp, Wp, C = x.shape
    Ho = (Hp - kh) // stride + 1
    Wo = (Wp - kw) // stride + 1
    cols = []
    for i in range(kh):
        for j in range(kw):
            cols.append(x[:, i:i + stride * (Ho - 1) + 1:stride,
                          j:j + stride * (Wo - 1) + 1:stride, :])
    patches = jnp.stack(cols, axis=3)               # (N, Ho, Wo, kh*kw, C)
    return patches.reshape(N, Ho, Wo, kh * kw * C), Ho, Wo


def init_raw_params(key, latent_space, hidden_size, H, W):
    ks = jax.random.split(key, 8)
    c1, c2 = 8, 16
    flat = c2 * (H // 4) * (W // 4)
    scale = 0.1
    return {
        "conv1_w": scale * jax.random.normal(ks[0], (c1, 1, 3, 3), jnp.float32),
        "conv1_b": scale * jax.random.normal(ks[1], (c1,), jnp.float32),
        "conv2_w": scale * jax.random.normal(ks[2], (c2, c1, 3, 3), jnp.float32),
        "conv2_b": scale * jax.random.normal(ks[3], (c2,), jnp.float32),
        "fc_w": scale * jax.random.normal(ks[4], (flat, latent_space), jnp.float32),
        "fc_b": scale * jax.random.normal(ks[5], (latent_space,), jnp.float32),
        # explicit gate axis, gate order (i, f, g, o); single bias (documented)
        "lstm_w_ih": scale * jax.random.normal(
            ks[6], (latent_space, 4, hidden_size), jnp.float32),
        "lstm_w_hh": scale * jax.random.normal(
            ks[7], (hidden_size, 4, hidden_size), jnp.float32),
        "lstm_b": jnp.zeros((4, hidden_size), jnp.float32),
    }


def prepare_params(raw):
    """Reshape / fold / cast raw parameters for the Pallas forward pass."""
    c1 = raw["conv1_w"].shape[0]
    c2 = raw["conv2_w"].shape[0]
    hidden = raw["lstm_w_hh"].shape[0]
    flat = raw["fc_w"].shape[0]
    # conv weights -> (Cout, kh*kw*Cin), matching the (kh, kw, Cin) patch
    # order; contraction dim zero-padded to a sublane multiple.
    w1 = jnp.transpose(raw["conv1_w"], (0, 2, 3, 1)).reshape(c1, -1)
    w2 = jnp.transpose(raw["conv2_w"], (0, 2, 3, 1)).reshape(c2, -1)
    w1 = jnp.pad(w1, ((0, 0), (0, (-w1.shape[1]) % 8)))
    w2 = jnp.pad(w2, ((0, 0), (0, (-w2.shape[1]) % 8)))
    # fold the (linear) FC into the LSTM input projection:
    #   x_gates = feat @ (fc_w @ w_ih) + (fc_b @ w_ih + b)
    wx = jnp.einsum("fl,lgh->fgh", raw["fc_w"], raw["lstm_w_ih"])
    wx = wx.reshape(flat, 4 * hidden)
    bx = (jnp.einsum("l,lgh->gh", raw["fc_b"], raw["lstm_w_ih"])
          + raw["lstm_b"]).reshape(1, 4 * hidden)
    whh = jnp.transpose(raw["lstm_w_hh"], (1, 0, 2))          # (4, H, H)
    return {
        "w1": w1.astype(jnp.bfloat16),
        "b1": raw["conv1_b"].reshape(c1, 1).astype(jnp.float32),
        "w2": w2.astype(jnp.bfloat16),
        "b2": raw["conv2_b"].reshape(c2, 1).astype(jnp.float32),
        "wx": wx.astype(jnp.bfloat16),
        "bx": bx.astype(jnp.float32),
        "whh": whh.astype(jnp.bfloat16),
    }


# ----------------------------------------------------------------------------
# Forward pass
# ----------------------------------------------------------------------------
# TODO(synk): the im2col patch gather stays in XLA as glue; it now runs once
# per conv layer for the whole (B*T) batch instead of once per frame.  Moving
# it in-kernel (shifted VPU MACs / strided ref slices) is a further option.
def encoder_xgates(p, frames):
    """frames: (N=B*T, H, W) -> LSTM x-gate pre-activations (N, 4*hidden).

    Conv matmuls run lane-dense: channels on the sublane axis, N*pixels on the
    lane axis, so every Pallas output is a >=128-lane slab."""
    N = frames.shape[0]
    # conv1 (+ReLU)
    p1, Ho1, Wo1 = _im2col(frames[..., None], 3, 3, 2, 1)       # (N, 8, 8, 9)
    p1 = p1.reshape(N * Ho1 * Wo1, -1).T                         # (9, N*64)
    p1 = jnp.pad(p1, ((0, p["w1"].shape[1] - p1.shape[0]), (0, 0)))
    y1 = matmul_bias_act(p["w1"], p1, p["b1"], act="relu")       # (8, N*64)
    # conv2 (+ReLU)
    c1 = y1.shape[0]
    y1 = y1.reshape(c1, N, Ho1, Wo1).transpose(1, 2, 3, 0)       # NHWC (glue)
    p2, Ho2, Wo2 = _im2col(y1, 3, 3, 2, 1)                       # (N, 4, 4, 72)
    p2 = p2.reshape(N * Ho2 * Wo2, -1).T                         # (72, N*16)
    p2 = jnp.pad(p2, ((0, p["w2"].shape[1] - p2.shape[0]), (0, 0)))
    y2 = matmul_bias_act(p["w2"], p2, p["b2"], act="relu")       # (16, N*16)
    # flatten (NHWC order) + folded FC -> LSTM input projection
    c2 = y2.shape[0]
    feat = y2.reshape(c2, N, Ho2 * Wo2).transpose(1, 2, 0).reshape(N, -1)
    return matmul_bias_act(feat, p["wx"], p["bx"], act="none")   # (N, 4*hidden)


def cae_lstm_encoder(params, x, hidden_size, init_states=None):
    """x: (B, T, H, W) -> (h_T, c_T), each (B, hidden_size)."""
    B, T, H, W = x.shape
    frames = x.reshape(B * T, H, W).astype(jnp.float32)
    xg = encoder_xgates(params, frames)                          # (B*T, 4H)
    # (B*T, 4H) -> (T, 4, B, H): time leading for the recurrence grid, gate
    # index on a non-lane axis.
    xg = xg.reshape(B, T, 4, hidden_size).transpose(1, 2, 0, 3)
    if init_states is None:
        h0 = jnp.zeros((B, hidden_size), jnp.float32)
        c0 = jnp.zeros((B, hidden_size), jnp.float32)
    else:
        h0 = init_states[0].astype(jnp.float32)
        c0 = init_states[1].astype(jnp.float32)
    return lstm_sequence(xg, params["whh"], h0, c0)


# ----------------------------------------------------------------------------
# Pure-JAX f32 reference (unfolded FC, per-step LSTM) for validation
# ----------------------------------------------------------------------------
def reference_forward(raw, x, hidden_size):
    B, T = x.shape[0], x.shape[1]
    Hd = hidden_size
    c1 = raw["conv1_w"].shape[0]
    c2 = raw["conv2_w"].shape[0]
    latent = raw["fc_w"].shape[1]
    w1m = jnp.transpose(raw["conv1_w"], (2, 3, 1, 0)).reshape(-1, c1)
    w2m = jnp.transpose(raw["conv2_w"], (2, 3, 1, 0)).reshape(-1, c2)
    w_ih = raw["lstm_w_ih"].reshape(latent, 4 * Hd)
    w_hh = raw["lstm_w_hh"].reshape(Hd, 4 * Hd)
    b = raw["lstm_b"].reshape(4 * Hd)
    h = jnp.zeros((B, Hd), jnp.float32)
    c = jnp.zeros((B, Hd), jnp.float32)
    for t in range(T):
        f = x[:, t, :, :][..., None]
        p1, _, _ = _im2col(f, 3, 3, 2, 1)
        y1 = jnp.maximum(jnp.einsum("nhwk,kc->nhwc", p1, w1m) + raw["conv1_b"], 0.0)
        p2, _, _ = _im2col(y1, 3, 3, 2, 1)
        y2 = jnp.maximum(jnp.einsum("nhwk,kc->nhwc", p2, w2m) + raw["conv2_b"], 0.0)
        lat = y2.reshape(B, -1) @ raw["fc_w"] + raw["fc_b"]
        gates = lat @ w_ih + h @ w_hh + b
        i_g = jax.nn.sigmoid(gates[:, 0 * Hd:1 * Hd])
        f_g = jax.nn.sigmoid(gates[:, 1 * Hd:2 * Hd])
        g_g = jnp.tanh(gates[:, 2 * Hd:3 * Hd])
        o_g = jax.nn.sigmoid(gates[:, 3 * Hd:4 * Hd])
        c = f_g * c + i_g * g_g
        h = o_g * jnp.tanh(c)
    return h, c


if __name__ == "__main__":
    B, T, H, W = 2, 8, 16, 16
    latent_space, hidden_size = 32, 32

    key = jax.random.PRNGKey(0)
    k_x, k_p = jax.random.split(key)
    x = jax.random.normal(k_x, (B, T, H, W), jnp.float32)
    raw = init_raw_params(k_p, latent_space, hidden_size, H, W)
    params = prepare_params(raw)

    fwd = jax.jit(functools.partial(cae_lstm_encoder, hidden_size=hidden_size))
    h_t, c_t = fwd(params, x)
    jax.block_until_ready((h_t, c_t))

    assert h_t.shape == (B, hidden_size) and c_t.shape == (B, hidden_size)
    assert bool(jnp.all(jnp.isfinite(h_t))) and bool(jnp.all(jnp.isfinite(c_t)))

    # bf16 MXU operands + the FC->w_ih fold change rounding slightly, hence
    # the loose tolerance.
    h_ref, c_ref = reference_forward(raw, x, hidden_size)
    err = max(float(jnp.max(jnp.abs(h_t - h_ref))),
              float(jnp.max(jnp.abs(c_t - c_ref))))
    assert err < 5e-2, f"mismatch vs pure-JAX reference: {err}"

    print("KERNEL_OK")
</pallas_src>

<mosaic_0001>
module attributes {stable_mosaic.version = 11 : i64} {
  func.func @_matmul_bias_kernel(%arg0: i32, %arg1: memref<8x16xbf16, #tpu.memory_space<vmem>>, %arg2: memref<16x512xf32, #tpu.memory_space<vmem>>, %arg3: memref<8x1xf32, #tpu.memory_space<vmem>>, %arg4: memref<8x512xf32, #tpu.memory_space<vmem>>) attributes {dimension_semantics = [#tpu.dimension_semantics<parallel>], iteration_bounds = array<i64: 2>, scalar_prefetch = 0 : i64, scratch_operands = 0 : i64, tpu.core_type = #tpu.core_type<tc>, window_params = [{pipeline_mode = #tpu.pipeline_mode<synchronous>, transform_indices = @transform_0, window_bounds = array<i64: 8, 16>}, {transform_indices = @transform_1, window_bounds = array<i64: 16, 512>}, {pipeline_mode = #tpu.pipeline_mode<synchronous>, transform_indices = @transform_2, window_bounds = array<i64: 8, 1>}, {transform_indices = @transform_3, window_bounds = array<i64: 8, 512>}]} {
    %c0 = arith.constant 0 : index
    %c0_0 = arith.constant 0 : index
    %0 = vector.load %arg1[%c0, %c0_0] : memref<8x16xbf16, #tpu.memory_space<vmem>>, vector<8x16xbf16>
    %c0_1 = arith.constant 0 : index
    %c0_2 = arith.constant 0 : index
    %1 = vector.load %arg2[%c0_1, %c0_2] : memref<16x512xf32, #tpu.memory_space<vmem>>, vector<16x512xf32>
    %2 = arith.truncf %1 : vector<16x512xf32> to vector<16x512xbf16>
    %cst = arith.constant dense<0.000000e+00> : vector<8x512xf32>
    %3 = tpu.matmul %0, %2, %cst {dimension_numbers = #tpu.dot_dimension_numbers<[1], [0], [0], [1], [0, 0, 1, 1], [], []>} : vector<8x16xbf16>, vector<16x512xbf16>, vector<8x512xf32> -> vector<8x512xf32>
    %c0_3 = arith.constant 0 : index
    %c0_4 = arith.constant 0 : index
    %4 = vector.load %arg3[%c0_3, %c0_4] : memref<8x1xf32, #tpu.memory_space<vmem>>, vector<8x1xf32>
    %5 = vector.broadcast %4 : vector<8x1xf32> to vector<8x512xf32>
    %6 = arith.addf %3, %5 : vector<8x512xf32>
    %cst_5 = arith.constant 0.000000e+00 : f32
    %7 = vector.broadcast %cst_5 : f32 to vector<8x512xf32>
    %8 = arith.maximumf %6, %7 : vector<8x512xf32>
    %c0_6 = arith.constant 0 : index
    %c0_7 = arith.constant 0 : index
    %9 = vector.load %arg4[%c0_6, %c0_7] : memref<8x512xf32, #tpu.memory_space<vmem>>, vector<8x512xf32>
    tpu.vector_store %arg4[%c0_6, %c0_7], %8 {strides = array<i32>} : memref<8x512xf32, #tpu.memory_space<vmem>>, vector<8x512xf32>,
    return
  }
  func.func @transform_0(%arg0: i32) -> (i32, i32) {
    %c0_i32 = arith.constant 0 : i32
    %c0_i32_0 = arith.constant 0 : i32
    %c0_i32_1 = arith.constant 0 : i32
    return %c0_i32, %c0_i32_0 : i32, i32
  }
  func.func @transform_1(%arg0: i32) -> (i32, i32) {
    %c0_i32 = arith.constant 0 : i32
    %c0_i32_0 = arith.constant 0 : i32
    return %c0_i32, %arg0 : i32, i32
  }
  func.func @transform_2(%arg0: i32) -> (i32, i32) {
    %c0_i32 = arith.constant 0 : i32
    %c0_i32_0 = arith.constant 0 : i32
    %c0_i32_1 = arith.constant 0 : i32
    return %c0_i32, %c0_i32_0 : i32, i32
  }
  func.func @transform_3(%arg0: i32) -> (i32, i32) {
    %c0_i32 = arith.constant 0 : i32
    %c0_i32_0 = arith.constant 0 : i32
    return %c0_i32, %arg0 : i32, i32
  }
}

module attributes {stable_mosaic.version = 11 : i64} {
  func.func @_matmul_bias_kernel(%arg0: i32, %arg1: memref<16x72xbf16, #tpu.memory_space<vmem>>, %arg2: memref<72x256xf32, #tpu.memory_space<vmem>>, %arg3: memref<16x1xf32, #tpu.memory_space<vmem>>, %arg4: memref<16x256xf32, #tpu.memory_space<vmem>>) attributes {dimension_semantics = [#tpu.dimension_semantics<parallel>], iteration_bounds = array<i64: 1>, scalar_prefetch = 0 : i64, scratch_operands = 0 : i64, tpu.core_type = #tpu.core_type<tc>, window_params = [{pipeline_mode = #tpu.pipeline_mode<synchronous>, transform_indices = @transform_0, window_bounds = array<i64: 16, 72>}, {transform_indices = @transform_1, window_bounds = array<i64: 72, 256>}, {pipeline_mode = #tpu.pipeline_mode<synchronous>, transform_indices = @transform_2, window_bounds = array<i64: 16, 1>}, {transform_indices = @transform_3, window_bounds = array<i64: 16, 256>}]} {
    %c0 = arith.constant 0 : index
    %c0_0 = arith.constant 0 : index
    %0 = vector.load %arg1[%c0, %c0_0] : memref<16x72xbf16, #tpu.memory_space<vmem>>, vector<16x72xbf16>
    %c0_1 = arith.constant 0 : index
    %c0_2 = arith.constant 0 : index
    %1 = vector.load %arg2[%c0_1, %c0_2] : memref<72x256xf32, #tpu.memory_space<vmem>>, vector<72x256xf32>
    %2 = arith.truncf %1 : vector<72x256xf32> to vector<72x256xbf16>
    %cst = arith.constant dense<0.000000e+00> : vector<16x256xf32>
    %3 = tpu.matmul %0, %2, %cst {dimension_numbers = #tpu.dot_dimension_numbers<[1], [0], [0], [1], [0, 0, 1, 1], [], []>} : vector<16x72xbf16>, vector<72x256xbf16>, vector<16x256xf32> -> vector<16x256xf32>
    %c0_3 = arith.constant 0 : index
    %c0_4 = arith.constant 0 : index
    %4 = vector.load %arg3[%c0_3, %c0_4] : memref<16x1xf32, #tpu.memory_space<vmem>>, vector<16x1xf32>
    %5 = vector.broadcast %4 : vector<16x1xf32> to vector<16x256xf32>
    %6 = arith.addf %3, %5 : vector<16x256xf32>
    %cst_5 = arith.constant 0.000000e+00 : f32
    %7 = vector.broadcast %cst_5 : f32 to vector<16x256xf32>
    %8 = arith.maximumf %6, %7 : vector<16x256xf32>
    %c0_6 = arith.constant 0 : index
    %c0_7 = arith.constant 0 : index
    %9 = vector.load %arg4[%c0_6, %c0_7] : memref<16x256xf32, #tpu.memory_space<vmem>>, vector<16x256xf32>
    tpu.vector_store %arg4[%c0_6, %c0_7], %8 {strides = array<i32>} : memref<16x256xf32, #tpu.memory_space<vmem>>, vector<16x256xf32>,
    return
  }
  func.func @transform_0(%arg0: i32) -> (i32, i32) {
    %c0_i32 = arith.constant 0 : i32
    %c0_i32_0 = arith.constant 0 : i32
    %c0_i32_1 = arith.constant 0 : i32
    return %c0_i32, %c0_i32_0 : i32, i32
  }
  func.func @transform_1(%arg0: i32) -> (i32, i32) {
    %c0_i32 = arith.constant 0 : i32
    %c0_i32_0 = arith.constant 0 : i32
    return %c0_i32, %arg0 : i32, i32
  }
  func.func @transform_2(%arg0: i32) -> (i32, i32) {
    %c0_i32 = arith.constant 0 : i32
    %c0_i32_0 = arith.constant 0 : i32
    %c0_i32_1 = arith.constant 0 : i32
    return %c0_i32, %c0_i32_0 : i32, i32
  }
  func.func @transform_3(%arg0: i32) -> (i32, i32) {
    %c0_i32 = arith.constant 0 : i32
    %c0_i32_0 = arith.constant 0 : i32
    return %c0_i32, %arg0 : i32, i32
  }
}

module attributes {stable_mosaic.version = 11 : i64} {
  func.func @_matmul_bias_kernel(%arg0: i32, %arg1: memref<16x256xf32, #tpu.memory_space<vmem>>, %arg2: memref<256x128xbf16, #tpu.memory_space<vmem>>, %arg3: memref<1x128xf32, #tpu.memory_space<vmem>>, %arg4: memref<16x128xf32, #tpu.memory_space<vmem>>) attributes {dimension_semantics = [#tpu.dimension_semantics<parallel>], iteration_bounds = array<i64: 1>, scalar_prefetch = 0 : i64, scratch_operands = 0 : i64, tpu.core_type = #tpu.core_type<tc>, window_params = [{pipeline_mode = #tpu.pipeline_mode<synchronous>, transform_indices = @transform_0, window_bounds = array<i64: 16, 256>}, {transform_indices = @transform_1, window_bounds = array<i64: 256, 128>}, {transform_indices = @transform_2, window_bounds = array<i64: 1, 128>}, {transform_indices = @transform_3, window_bounds = array<i64: 16, 128>}]} {
    %c0 = arith.constant 0 : index
    %c0_0 = arith.constant 0 : index
    %0 = vector.load %arg1[%c0, %c0_0] : memref<16x256xf32, #tpu.memory_space<vmem>>, vector<16x256xf32>
    %1 = arith.truncf %0 : vector<16x256xf32> to vector<16x256xbf16>
    %c0_1 = arith.constant 0 : index
    %c0_2 = arith.constant 0 : index
    %2 = vector.load %arg2[%c0_1, %c0_2] : memref<256x128xbf16, #tpu.memory_space<vmem>>, vector<256x128xbf16>
    %cst = arith.constant dense<0.000000e+00> : vector<16x128xf32>
    %3 = tpu.matmul %1, %2, %cst {dimension_numbers = #tpu.dot_dimension_numbers<[1], [0], [0], [1], [0, 0, 1, 1], [], []>} : vector<16x256xbf16>, vector<256x128xbf16>, vector<16x128xf32> -> vector<16x128xf32>
    %c0_3 = arith.constant 0 : index
    %c0_4 = arith.constant 0 : index
    %4 = vector.load %arg3[%c0_3, %c0_4] : memref<1x128xf32, #tpu.memory_space<vmem>>, vector<1x128xf32>
    %5 = vector.broadcast %4 : vector<1x128xf32> to vector<16x128xf32>
    %6 = arith.addf %3, %5 : vector<16x128xf32>
    %c0_5 = arith.constant 0 : index
    %c0_6 = arith.constant 0 : index
    %7 = vector.load %arg4[%c0_5, %c0_6] : memref<16x128xf32, #tpu.memory_space<vmem>>, vector<16x128xf32>
    tpu.vector_store %arg4[%c0_5, %c0_6], %6 {strides = array<i32>} : memref<16x128xf32, #tpu.memory_space<vmem>>, vector<16x128xf32>,
    return
  }
  func.func @transform_0(%arg0: i32) -> (i32, i32) {
    %c0_i32 = arith.constant 0 : i32
    %c0_i32_0 = arith.constant 0 : i32
    %c0_i32_1 = arith.constant 0 : i32
    return %c0_i32, %c0_i32_0 : i32, i32
  }
  func.func @transform_1(%arg0: i32) -> (i32, i32) {
    %c0_i32 = arith.constant 0 : i32
    %c0_i32_0 = arith.constant 0 : i32
    return %c0_i32, %arg0 : i32, i32
  }
  func.func @transform_2(%arg0: i32) -> (i32, i32) {
    %c0_i32 = arith.constant 0 : i32
    %c0_i32_0 = arith.constant 0 : i32
    return %c0_i32, %arg0 : i32, i32
  }
  func.func @transform_3(%arg0: i32) -> (i32, i32) {
    %c0_i32 = arith.constant 0 : i32
    %c0_i32_0 = arith.constant 0 : i32
    return %c0_i32, %arg0 : i32, i32
  }
}

module attributes {stable_mosaic.version = 11 : i64} {
  func.func @_lstm_seq_kernel(%arg0: i32, %arg1: memref<1x4x2x32xf32, #tpu.memory_space<vmem>>, %arg2: memref<4x32x32xbf16, #tpu.memory_space<vmem>>, %arg3: memref<2x32xf32, #tpu.memory_space<vmem>>, %arg4: memref<2x32xf32, #tpu.memory_space<vmem>>, %arg5: memref<2x32xf32, #tpu.memory_space<vmem>>, %arg6: memref<2x32xf32, #tpu.memory_space<vmem>>, %arg7: memref<2x32xf32, #tpu.memory_space<vmem>>, %arg8: memref<2x32xf32, #tpu.memory_space<vmem>>) attributes {dimension_semantics = [#tpu.dimension_semantics<arbitrary>], iteration_bounds = array<i64: 8>, scalar_prefetch = 0 : i64, scratch_operands = 2 : i64, tpu.core_type = #tpu.core_type<tc>, window_params = [{transform_indices = @transform_0, window_bounds = array<i64: 1, 4, 2, 32>}, {pipeline_mode = #tpu.pipeline_mode<synchronous>, transform_indices = @transform_1, window_bounds = array<i64: 4, 32, 32>}, {pipeline_mode = #tpu.pipeline_mode<synchronous>, transform_indices = @transform_2, window_bounds = array<i64: 2, 32>}, {pipeline_mode = #tpu.pipeline_mode<synchronous>, transform_indices = @transform_3, window_bounds = array<i64: 2, 32>}, {pipeline_mode = #tpu.pipeline_mode<synchronous>, transform_indices = @transform_4, window_bounds = array<i64: 2, 32>}, {pipeline_mode = #tpu.pipeline_mode<synchronous>, transform_indices = @transform_5, window_bounds = array<i64: 2, 32>}]} {
    %c0_i32 = arith.constant 0 : i32
    %0 = arith.cmpi eq, %arg0, %c0_i32 : i32
    %1 = arith.extui %0 : i1 to i32
    %c0_i32_0 = arith.constant 0 : i32
    %2 = arith.cmpi ne, %1, %c0_i32_0 : i32
    scf.if %2 {
      %c0_40 = arith.constant 0 : index
      %c0_41 = arith.constant 0 : index
      %56 = vector.load %arg3[%c0_40, %c0_41] : memref<2x32xf32, #tpu.memory_space<vmem>>, vector<2x32xf32>
      %c0_42 = arith.constant 0 : index
      %c0_43 = arith.constant 0 : index
      %57 = vector.load %arg7[%c0_42, %c0_43] : memref<2x32xf32, #tpu.memory_space<vmem>>, vector<2x32xf32>
      tpu.vector_store %arg7[%c0_42, %c0_43], %56 {strides = array<i32>} : memref<2x32xf32, #tpu.memory_space<vmem>>, vector<2x32xf32>,
      %c0_44 = arith.constant 0 : index
      %c0_45 = arith.constant 0 : index
      %58 = vector.load %arg4[%c0_44, %c0_45] : memref<2x32xf32, #tpu.memory_space<vmem>>, vector<2x32xf32>
      %c0_46 = arith.constant 0 : index
      %c0_47 = arith.constant 0 : index
      %59 = vector.load %arg8[%c0_46, %c0_47] : memref<2x32xf32, #tpu.memory_space<vmem>>, vector<2x32xf32>
      tpu.vector_store %arg8[%c0_46, %c0_47], %58 {strides = array<i32>} : memref<2x32xf32, #tpu.memory_space<vmem>>, vector<2x32xf32>,
    } else {
    }
    %c0 = arith.constant 0 : index
    %c0_1 = arith.constant 0 : index
    %3 = vector.load %arg7[%c0, %c0_1] : memref<2x32xf32, #tpu.memory_space<vmem>>, vector<2x32xf32>
    %c0_2 = arith.constant 0 : index
    %c0_3 = arith.constant 0 : index
    %4 = vector.load %arg8[%c0_2, %c0_3] : memref<2x32xf32, #tpu.memory_space<vmem>>, vector<2x32xf32>
    %5 = arith.truncf %3 : vector<2x32xf32> to vector<2x32xbf16>
    %c0_4 = arith.constant 0 : index
    %c0_5 = arith.constant 0 : index
    %c0_6 = arith.constant 0 : index
    %c0_7 = arith.constant 0 : index
    %6 = vector.load %arg1[%c0_4, %c0_5, %c0_6, %c0_7] : memref<1x4x2x32xf32, #tpu.memory_space<vmem>>, vector<1x1x2x32xf32>
    %7 = vector.shape_cast %6 : vector<1x1x2x32xf32> to vector<2x32xf32>
    %c0_8 = arith.constant 0 : index
    %c0_9 = arith.constant 0 : index
    %c0_10 = arith.constant 0 : index
    %8 = vector.load %arg2[%c0_8, %c0_9, %c0_10] : memref<4x32x32xbf16, #tpu.memory_space<vmem>>, vector<1x32x32xbf16>
    %9 = vector.shape_cast %8 : vector<1x32x32xbf16> to vector<32x32xbf16>
    %cst = arith.constant dense<0.000000e+00> : vector<2x32xf32>
    %10 = tpu.matmul %5, %9, %cst {dimension_numbers = #tpu.dot_dimension_numbers<[1], [0], [0], [1], [0, 0, 1, 1], [], []>} : vector<2x32xbf16>, vector<32x32xbf16>, vector<2x32xf32> -> vector<2x32xf32>
    %11 = arith.addf %7, %10 : vector<2x32xf32>
    %c0_11 = arith.constant 0 : index
    %c1 = arith.constant 1 : index
    %c0_12 = arith.constant 0 : index
    %c0_13 = arith.constant 0 : index
    %12 = vector.load %arg1[%c0_11, %c1, %c0_12, %c0_13] : memref<1x4x2x32xf32, #tpu.memory_space<vmem>>, vector<1x1x2x32xf32>
    %13 = vector.shape_cast %12 : vector<1x1x2x32xf32> to vector<2x32xf32>
    %c1_14 = arith.constant 1 : index
    %c0_15 = arith.constant 0 : index
    %c0_16 = arith.constant 0 : index
    %14 = vector.load %arg2[%c1_14, %c0_15, %c0_16] : memref<4x32x32xbf16, #tpu.memory_space<vmem>>, vector<1x32x32xbf16>
    %15 = vector.shape_cast %14 : vector<1x32x32xbf16> to vector<32x32xbf16>
    %cst_17 = arith.constant dense<0.000000e+00> : vector<2x32xf32>
    %16 = tpu.matmul %5, %15, %cst_17 {dimension_numbers = #tpu.dot_dimension_numbers<[1], [0], [0], [1], [0, 0, 1, 1], [], []>} : vector<2x32xbf16>, vector<32x32xbf16>, vector<2x32xf32> -> vector<2x32xf32>
    %17 = arith.addf %13, %16 : vector<2x32xf32>
    %c0_18 = arith.constant 0 : index
    %c2 = arith.constant 2 : index
    %c0_19 = arith.constant 0 : index
    %c0_20 = arith.constant 0 : index
    %18 = vector.load %arg1[%c0_18, %c2, %c0_19, %c0_20] : memref<1x4x2x32xf32, #tpu.memory_space<vmem>>, vector<1x1x2x32xf32>
    %19 = vector.shape_cast %18 : vector<1x1x2x32xf32> to vector<2x32xf32>
    %c2_21 = arith.constant 2 : index
    %c0_22 = arith.constant 0 : index
    %c0_23 = arith.constant 0 : index
    %20 = vector.load %arg2[%c2_21, %c0_22, %c0_23] : memref<4x32x32xbf16, #tpu.memory_space<vmem>>, vector<1x32x32xbf16>
    %21 = vector.shape_cast %20 : vector<1x32x32xbf16> to vector<32x32xbf16>
    %cst_24 = arith.constant dense<0.000000e+00> : vector<2x32xf32>
    %22 = tpu.matmul %5, %21, %cst_24 {dimension_numbers = #tpu.dot_dimension_numbers<[1], [0], [0], [1], [0, 0, 1, 1], [], []>} : vector<2x32xbf16>, vector<32x32xbf16>, vector<2x32xf32> -> vector<2x32xf32>
    %23 = arith.addf %19, %22 : vector<2x32xf32>
    %c0_25 = arith.constant 0 : index
    %c3 = arith.constant 3 : index
    %c0_26 = arith.constant 0 : index
    %c0_27 = arith.constant 0 : index
    %24 = vector.load %arg1[%c0_25, %c3, %c0_26, %c0_27] : memref<1x4x2x32xf32, #tpu.memory_space<vmem>>, vector<1x1x2x32xf32>
    %25 = vector.shape_cast %24 : vector<1x1x2x32xf32> to vector<2x32xf32>
    %c3_28 = arith.constant 3 : index
    %c0_29 = arith.constant 0 : index
    %c0_30 = arith.constant 0 : index
    %26 = vector.load %arg2[%c3_28, %c0_29, %c0_30] : memref<4x32x32xbf16, #tpu.memory_space<vmem>>, vector<1x32x32xbf16>
    %27 = vector.shape_cast %26 : vector<1x32x32xbf16> to vector<32x32xbf16>
    %cst_31 = arith.constant dense<0.000000e+00> : vector<2x32xf32>
    %28 = tpu.matmul %5, %27, %cst_31 {dimension_numbers = #tpu.dot_dimension_numbers<[1], [0], [0], [1], [0, 0, 1, 1], [], []>} : vector<2x32xbf16>, vector<32x32xbf16>, vector<2x32xf32> -> vector<2x32xf32>
    %29 = arith.addf %25, %28 : vector<2x32xf32>
    %30 = arith.negf %11 : vector<2x32xf32>
    %31 = math.exp %30 : vector<2x32xf32>
    %cst_32 = arith.constant 1.000000e+00 : f32
    %32 = vector.broadcast %cst_32 : f32 to vector<2x32xf32>
    %33 = arith.addf %32, %31 : vector<2x32xf32>
    %34 = arith.divf %32, %33 : vector<2x32xf32>
    %35 = arith.negf %17 : vector<2x32xf32>
    %36 = math.exp %35 : vector<2x32xf32>
    %cst_33 = arith.constant 1.000000e+00 : f32
    %37 = vector.broadcast %cst_33 : f32 to vector<2x32xf32>
    %38 = arith.addf %37, %36 : vector<2x32xf32>
    %39 = arith.divf %37, %38 : vector<2x32xf32>
    %40 = math.tanh %23 : vector<2x32xf32>
    %41 = arith.negf %29 : vector<2x32xf32>
    %42 = math.exp %41 : vector<2x32xf32>
    %cst_34 = arith.constant 1.000000e+00 : f32
    %43 = vector.broadcast %cst_34 : f32 to vector<2x32xf32>
    %44 = arith.addf %43, %42 : vector<2x32xf32>
    %45 = arith.divf %43, %44 : vector<2x32xf32>
    %46 = arith.mulf %39, %4 : vector<2x32xf32>
    %47 = arith.mulf %34, %40 : vector<2x32xf32>
    %48 = arith.addf %46, %47 : vector<2x32xf32>
    %49 = math.tanh %48 : vector<2x32xf32>
    %50 = arith.mulf %45, %49 : vector<2x32xf32>
    %c0_35 = arith.constant 0 : index
    %c0_36 = arith.constant 0 : index
    %51 = vector.load %arg7[%c0_35, %c0_36] : memref<2x32xf32, #tpu.memory_space<vmem>>, vector<2x32xf32>
    tpu.vector_store %arg7[%c0_35, %c0_36], %50 {strides = array<i32>} : memref<2x32xf32, #tpu.memory_space<vmem>>, vector<2x32xf32>,
    %c0_37 = arith.constant 0 : index
    %c0_38 = arith.constant 0 : index
    %52 = vector.load %arg8[%c0_37, %c0_38] : memref<2x32xf32, #tpu.memory_space<vmem>>, vector<2x32xf32>
    tpu.vector_store %arg8[%c0_37, %c0_38], %48 {strides = array<i32>} : memref<2x32xf32, #tpu.memory_space<vmem>>, vector<2x32xf32>,
    %c7_i32 = arith.constant 7 : i32
    %53 = arith.cmpi eq, %arg0, %c7_i32 : i32
    %54 = arith.extui %53 : i1 to i32
    %c0_i32_39 = arith.constant 0 : i32
    %55 = arith.cmpi ne, %54, %c0_i32_39 : i32
    scf.if %55 {
      %c0_40 = arith.constant 0 : index
      %c0_41 = arith.constant 0 : index
      %56 = vector.load %arg5[%c0_40, %c0_41] : memref<2x32xf32, #tpu.memory_space<vmem>>, vector<2x32xf32>
      tpu.vector_store %arg5[%c0_40, %c0_41], %50 {strides = array<i32>} : memref<2x32xf32, #tpu.memory_space<vmem>>, vector<2x32xf32>,
      %c0_42 = arith.constant 0 : index
      %c0_43 = arith.constant 0 : index
      %57 = vector.load %arg6[%c0_42, %c0_43] : memref<2x32xf32, #tpu.memory_space<vmem>>, vector<2x32xf32>
      tpu.vector_store %arg6[%c0_42, %c0_43], %48 {strides = array<i32>} : memref<2x32xf32, #tpu.memory_space<vmem>>, vector<2x32xf32>,
    } else {
    }
    return
  }
  func.func @transform_0(%arg0: i32) -> (i32, i32, i32, i32) {
    %c0_i32 = arith.constant 0 : i32
    %c0_i32_0 = arith.constant 0 : i32
    %c0_i32_1 = arith.constant 0 : i32
    %c0_i32_2 = arith.constant 0 : i32
    return %arg0, %c0_i32, %c0_i32_0, %c0_i32_1 : i32, i32, i32, i32
  }
  func.func @transform_1(%arg0: i32) -> (i32, i32, i32) {
    %c0_i32 = arith.constant 0 : i32
    %c0_i32_0 = arith.constant 0 : i32
    %c0_i32_1 = arith.constant 0 : i32
    %c0_i32_2 = arith.constant 0 : i32
    return %c0_i32, %c0_i32_0, %c0_i32_1 : i32, i32, i32
  }
  func.func @transform_2(%arg0: i32) -> (i32, i32) {
    %c0_i32 = arith.constant 0 : i32
    %c0_i32_0 = arith.constant 0 : i32
    %c0_i32_1 = arith.constant 0 : i32
    return %c0_i32, %c0_i32_0 : i32, i32
  }
  func.func @transform_3(%arg0: i32) -> (i32, i32) {
    %c0_i32 = arith.constant 0 : i32
    %c0_i32_0 = arith.constant 0 : i32
    %c0_i32_1 = arith.constant 0 : i32
    return %c0_i32, %c0_i32_0 : i32, i32
  }
  func.func @transform_4(%arg0: i32) -> (i32, i32) {
    %c0_i32 = arith.constant 0 : i32
    %c0_i32_0 = arith.constant 0 : i32
    %c0_i32_1 = arith.constant 0 : i32
    return %c0_i32, %c0_i32_0 : i32, i32
  }
  func.func @transform_5(%arg0: i32) -> (i32, i32) {
    %c0_i32 = arith.constant 0 : i32
    %c0_i32_0 = arith.constant 0 : i32
    %c0_i32_1 = arith.constant 0 : i32
    return %c0_i32, %c0_i32_0 : i32, i32
  }
}

</mosaic_0001>

<bundles_post_ra>
// kernel: cae_lstm_encoder.4
= control target key start
LH: loop header
LB: loop body
LE: loop exit
PB: predicated region body
PF: predicated region fallthrough
CT: control target
= control target key end

     0   :  { %s442_s12 = smov 0   ;;  %s444_s13 = smov 0   ;;  %s500_s0 = inlined_call_operand.vmem [shape: bf16[8,16], index: 0, kind: input, shape index: {}]   ;;  %s501_s1 = inlined_call_operand.vmem [shape: f32[16,1024], index: 1, kind: input, shape index: {}]   ;;  %s502_s2 = inlined_call_operand.vmem [shape: f32[8,1], index: 2, kind: input, shape index: {}]   ;;  %s503_s3 = inlined_call_operand.vmem [shape: f32[8,1024], index: 3, kind: output, shape index: {}]  }
   0x1   :  { %s446_s14 = smov 0  }
   0x2 LB: > { %s353_s15 = sadd.s32 4294967295, %s419_s14   ;;  %s459_s16 = sadd.s32 1, %s419_s14   ;;  %s419_s14 = sphi %s446_s14, %s506_s14   ;;  %s415_s13 = sphi %s444_s13, %s505_s13   ;;  %s411_s12 = sphi %s442_s12, %s504_s12  }
   0x3   : > { %s38_s17 = ssub.s32 %s419_s14, %s459_s16  ;;  %s41_s18 = sadd.s32 1, %s415_s13 }
   0x4   : > { %p39_p0 = scmp.eq.s32.totalorder %s38_s17, 0  ;;  %p48_p1 = scmp.ne.s32.totalorder %s415_s13, %s411_s12 }
   0x5   : > { %p49_p2 = scmp.eq.s32.totalorder %s419_s14, 0  ;;  %p356_p4 = scmp.ge.s32.totalorder %s419_s14, 2 }
   0x6   : > { %s468_s19 = scalar_select %p39_p0, %s415_s13, %s41_s18  }
   0x7   : > { %p50_p3 = por %p49_p2, %p48_p1  ;;  %127 = sbr.rel (%p356_p4) target bundleno = 24 (0x18), region = 24 }
   0xc   : > { %130 = sbr.rel (!%p50_p3) target bundleno = 24 (0x18), region = 28  ;;  %s132_s20 = sand.u32 (%p50_p3), 1, %s415_s13  }
   0xd   : > { %s370_s21 = sshll.u32 (%p50_p3), %s419_s14, 5  ;;  %s357_s22 = sshll.u32 (%p50_p3), %s132_s20, 6 }
   0xe   : > { %s137_s25 = scalar_lea.vmem (%p50_p3), %s501_s1, %s370_s21  ;;  %s134_s26 = scalar_lea.vmem (%p50_p3), [#allocation2], %s357_s22 }
   0xf   : > { %v150_v0 = vld [vmem:[%s137_s25] sm:$0xff] (%p50_p3)  ;;  %v152_v1 = vld [vmem:[%s137_s25 + $0x8] sm:$0xff] (%p50_p3)  ;;  %v154_v2 = vld [vmem:[%s137_s25 + $0x10] sm:$0xff] (%p50_p3) }
  0x10   : > { %151 = vst [vmem:[%s134_s26] sm:$0xff] (%p50_p3), %v150_v0  ;;  %v156_v3 = vld [vmem:[%s137_s25 + $0x18] sm:$0xff] (%p50_p3)  ;;  %v158_v4 = vld [vmem:[%s137_s25 + $0x40] sm:$0xff] (%p50_p3)  ;;  %v160_v5 = vld [vmem:[%s137_s25 + $0x48] sm:$0xff] (%p50_p3) }
  0x11   : > { %153 = vst [vmem:[%s134_s26 + $0x8] sm:$0xff] %v152_v1  ;;  %v162_v6 = vld [vmem:[%s137_s25 + $0x50] sm:$0xff]  ;;  %v164_v7 = vld [vmem:[%s137_s25 + $0x58] sm:$0xff] }
  0x12   : > { %155 = vst [vmem:[%s134_s26 + $0x10] sm:$0xff] %v154_v2 }
  0x13   : > { %157 = vst [vmem:[%s134_s26 + $0x18] sm:$0xff] %v156_v3 }
  0x14   : > { %159 = vst [vmem:[%s134_s26 + $0x20] sm:$0xff] %v158_v4 }
  0x15   : > { %161 = vst [vmem:[%s134_s26 + $0x28] sm:$0xff] %v160_v5 }
  0x16   : > { %163 = vst [vmem:[%s134_s26 + $0x30] sm:$0xff] %v162_v6 }
  0x17   : > { %165 = vst [vmem:[%s134_s26 + $0x38] sm:$0xff] %v164_v7 }
  0x18 PF: > { %p360_p5 = scmp.ge.s32.totalorder %s419_s14, 1  ;;  %p170_p6 = scmp.lt.s32.totalorder %s419_s14, 3 }
  0x1a   : > { %p171_p7 = pnand %p360_p5, %p170_p6 }
  0x1b   : > { %s177_s27 = sand.u32 (!%p171_p7), 1, %s411_s12   ;;  %s362_s7 = sshll.u32 (!%p171_p7), %s353_s15, 2 }
  0x1c   : > { %174 = sbr.rel (%p171_p7) target bundleno = 182 (0xb6), region = 51  ;;  %s361_s30 = sshll.u32 (!%p171_p7), %s177_s27, 6 }
  0x1d   : > { %s179_s4 = scalar_lea.vmem (!%p171_p7), [#allocation2], %s361_s30  ;;  %p202_p8 = scmp.lt.s32.totalorder (!%p171_p7), %s362_s7, 7 }
  0x21   : > { %v221_v8 = vld [vmem:[%s502_s2] sm:$0xff]  ;;  %v421_v9 = vmov 0   ;;  %v210_v12 = vld [vmem:[%s179_s4 + $0x8] sm:$0xff]  ;;  %v211_v15 = vld [vmem:[%s179_s4 + $0x10] sm:$0xff]  ;;  %vm227_vm0 = vcmask 130048   ;;  %s508_s7 = smov (!%p202_p8, %s362_s7), 7 }
  0x22   : > { %396 = vset.pattern.permute.xlu0 %v421_v9  ;;  %v209_v10 = vld [vmem:[%s179_s4] sm:$0xff]  ;;  %v214_v14 = vld [vmem:[%s179_s4 + $0x28] sm:$0xff]  ;;  %v215_v16 = vld [vmem:[%s179_s4 + $0x30] sm:$0xff]  ;;  %s363_s8 = sshll.u32 %s508_s7, 3 }
  0x23   : > { %224 = vperm.xlu0 %396, %v221_v8   ;;  %v213_v11 = vld [vmem:[%s179_s4 + $0x20] sm:$0xff]  ;;  %v218_v17 = vpack.c.bf16 %v214_v14, %v210_v12  ;;  %v219_v18 = vpack.c.bf16 %v215_v16, %v211_v15  ;;  %v212_v19 = vld [vmem:[%s179_s4 + $0x18] sm:$0xff]  ;;  %s205_s11 = scalar_lea.vmem %s503_s3, %s363_s8 }
  0x24   : > { %v217_v13 = vpack.c.bf16 %v213_v11, %v209_v10  ;;  %v216_v20 = vld [vmem:[%s179_s4 + $0x38] sm:$0xff]  ;;  %v208_v22 = vld [vmem:[%s500_s0] sm:$0xf] }
  0x25   : > { %v220_v21 = vpack.c.bf16 %v216_v20, %v212_v19  ;;  %251 = vmatpush.bf16.msra.mxu1 %v218_v17  ;;  %264 = vmatpush.bf16.msra.mxu2 %v219_v18 }
  0x26   : > { %238 = vmatpush.bf16.msra.mxu0 %v217_v13 }
  0x27   : > { %277 = vmatpush.bf16.msra.mxu3 %v220_v21 }
  0x28   : > { %365 = vmatmul.msk.bf16.vlgmr.msra.gmra.mxu1 %vm227_vm0, %v208_v22  ;;  %366 = vmatmul.msk.bf16.vlgmr.msra.gmra.mxu2 %vm227_vm0, %v208_v22 }
  0x29   : > { %364 = vmatmul.msk.bf16.vlgmr.msra.gmra.mxu0 %vm227_vm0, %v208_v22 }
  0x2a   : > { %367 = vmatmul.msk.bf16.vlgmr.msra.gmra.mxu3 %vm227_vm0, %v208_v22 }
  0x95   : > { %v225_v23 = vpop.permute.xlu0 %224 }
  0xa5   : > { %v253_v25 = vpop.f32.mrf.mxu1 }
  0xa6   : > { %v240_v24 = vpop.f32.mrf.mxu0  ;;  %v254_v27 = vadd.f32 %v253_v25, %v225_v23 }
  0xa7   : > { %v241_v26 = vadd.f32 %v240_v24, %v225_v23 }
  0xa8   : > { %v284_v29 = vmax.f32 %v254_v27, 0.0 }
  0xa9   : > { %v283_v28 = vmax.f32 %v241_v26, 0.0 }
  0xaa   : > { %288 = vst [vmem:[%s205_s11 + $0x8] sm:$0xff] %v284_v29 }
  0xab   : > { %287 = vst [vmem:[%s205_s11] sm:$0xff] %v283_v28  ;;  %v266_v30 = vpop.f32.mrf.mxu2 }
  0xac   : > { %v267_v31 = vadd.f32 %v266_v30, %v225_v23 }
  0xad   : > { %v279_v32 = vpop.f32.mrf.mxu3  ;;  %v255_v35 = vpop.f32.mrf.mxu1 }
  0xae   : > { %v242_v33 = vpop.f32.mrf.mxu0  ;;  %v280_v34 = vadd.f32 %v279_v32, %v225_v23  ;;  %v285_v36 = vmax.f32 %v267_v31, 0.0 }
  0xb0   : > { %v286_v37 = vmax.f32 %v280_v34, 0.0  ;;  %289 = vst [vmem:[%s205_s11 + $0x10] sm:$0xff] %v285_v36 }
  0xb2   : > { %290 = vst [vmem:[%s205_s11 + $0x18] sm:$0xff] %v286_v37 }
  0xb3   : > { %v268_v38 = vpop.f32.mrf.mxu2 }
  0xb5   : > { %v281_v39 = vpop.f32.mrf.mxu3 }
  0xb6 PF: > { %p10_p9 = scmp.ge.s32.totalorder %s459_s16, 4   ;;  %s504_s12 = smov %s415_s13 }
  0xb7   : > { %s505_s13 = smov %s468_s19  ;;  %s506_s14 = smov %s459_s16 }
  0xb8   :  { %12 = sbr.rel (!%p10_p9) target bundleno = 2 (0x2), region = 90 }

// kernel: cae_lstm_encoder.5
= control target key start
LH: loop header
LB: loop body
LE: loop exit
PB: predicated region body
PF: predicated region fallthrough
CT: control target
= control target key end

     0   :  { %vm66_vm0 = vcmask 1043456   ;;  %v122_v3 = vmov 0   ;;  %vm62_vm1 = vcmask 588800   ;;  %s218_s1 = inlined_call_operand.vmem [shape: f32[72,256], index: 1, kind: input, shape index: {}]   ;;  %s219_s2 = inlined_call_operand.vmem [shape: f32[16,1], index: 2, kind: input, shape index: {}]   ;;  %s220_s0 = inlined_call_operand.vmem [shape: bf16[16,72], index: 0, kind: input, shape index: {}]   ;;  %s221_s3 = inlined_call_operand.vmem [shape: f32[16,256], index: 3, kind: output, shape index: {}]  }
   0x1   :  { %v33_v0 = vld [vmem:[%s218_s1 + $0x80] sm:$0xff]  ;;  %v34_v1 = vld [vmem:[%s218_s1 + $0x88] sm:$0xff]  ;;  %121 = vset.pattern.permute.xlu0 %v122_v3  ;;  %v31_v6 = vld [vmem:[%s218_s1 + $0x70] sm:$0xff] }
   0x2   :  { %v29_v2 = vld [vmem:[%s218_s1 + $0x60] sm:$0xff]  ;;  %v43_v4 = vpack.c.bf16 %v33_v0, %v33_v0  ;;  %v44_v5 = vpack.c.bf16 %v34_v1, %v34_v1  ;;  %v30_v7 = vld [vmem:[%s218_s1 + $0x68] sm:$0xff]  ;;  %v32_v8 = vld [vmem:[%s218_s1 + $0x78] sm:$0xff] }
   0x3   :  { %v41_v11 = vpack.c.bf16 %v31_v6, %v29_v2  ;;  %v42_v12 = vpack.c.bf16 %v32_v8, %v30_v7  ;;  %v25_v13 = vld [vmem:[%s218_s1 + $0x40] sm:$0xff]  ;;  %v27_v14 = vld [vmem:[%s218_s1 + $0x50] sm:$0xff]  ;;  %v26_v15 = vld [vmem:[%s218_s1 + $0x48] sm:$0xff] }
   0x4   :  { %v68_v9 = vsel %vm66_vm0, %v43_v4, 0  ;;  %v71_v10 = vsel %vm66_vm0, %v44_v5, 0  ;;  %v28_v16 = vld [vmem:[%s218_s1 + $0x58] sm:$0xff]  ;;  %v45_v17 = vld [vmem:[%s219_s2] sm:$0xff]  ;;  %v39_v18 = vpack.c.bf16 %v27_v14, %v25_v13  ;;  %v23_v21 = vld [vmem:[%s218_s1 + $0x30] sm:$0xff] }
   0x5   :  { %76 = vmatpush.bf16.msra.mxu0 %v68_v9  ;;  %90 = vmatpush.bf16.msra.mxu1 %v71_v10  ;;  %v40_v19 = vpack.c.bf16 %v28_v16, %v26_v15  ;;  %v21_v20 = vld [vmem:[%s218_s1 + $0x20] sm:$0xff]  ;;  %v22_v22 = vld [vmem:[%s218_s1 + $0x28] sm:$0xff]  ;;  %v24_v23 = vld [vmem:[%s218_s1 + $0x38] sm:$0xff] }
   0x6   :  { %49 = vperm.xlu0 %121, %v45_v17   ;;  %v37_v24 = vpack.c.bf16 %v23_v21, %v21_v20  ;;  %v38_v25 = vpack.c.bf16 %v24_v23, %v22_v22  ;;  %v17_v26 = vld [vmem:[%s218_s1] sm:$0xff]  ;;  %v46_v27 = vld [vmem:[%s219_s2 + $0x8] sm:$0xff]  ;;  %v19_v28 = vld [vmem:[%s218_s1 + $0x10] sm:$0xff] }
   0x7   :  { %v18_v29 = vld [vmem:[%s218_s1 + $0x8] sm:$0xff]  ;;  %v20_v30 = vld [vmem:[%s218_s1 + $0x18] sm:$0xff]  ;;  %v35_v31 = vpack.c.bf16 %v19_v28, %v17_v26  ;;  %v119_v33 = vld [vmem:[%s220_s0] sm:$0xff] }
   0x8   :  { %v36_v32 = vpack.c.bf16 %v20_v30, %v18_v29 }
   0x9   :  { %77 = vmatpush.bf16.msra.mxu0 %v41_v11  ;;  %91 = vmatpush.bf16.msra.mxu1 %v42_v12 }
   0xd   :  { %78 = vmatpush.bf16.msra.mxu0 %v39_v18  ;;  %92 = vmatpush.bf16.msra.mxu1 %v40_v19 }
   0xe   :  { %54 = vperm.xlu0 %121, %v46_v27  }
  0x11   :  { %79 = vmatpush.bf16.msra.mxu0 %v37_v24  ;;  %93 = vmatpush.bf16.msra.mxu1 %v38_v25 }
  0x15   :  { %80 = vmatpush.bf16.msra.mxu0 %v35_v31  ;;  %94 = vmatpush.bf16.msra.mxu1 %v36_v32 }
  0x18   :  { %117 = vmatmul.msk.bf16.vlgmr.msra.gmra.mxu0 %vm62_vm1, %v119_v33  ;;  %118 = vmatmul.msk.bf16.vlgmr.msra.gmra.mxu1 %vm62_vm1, %v119_v33 }
  0x78   :  { %v50_v34 = vpop.permute.xlu0 %49 }
  0x80   :  { %v55_v41 = vpop.permute.xlu0 %54 }
  0x95   :  { %v82_v35 = vpop.f32.mrf.mxu0  ;;  %v96_v36 = vpop.f32.mrf.mxu1 }
  0x96   :  { %v83_v37 = vadd.f32 %v82_v35, %v50_v34  ;;  %v97_v38 = vadd.f32 %v96_v36, %v50_v34 }
  0x98   :  { %v101_v39 = vmax.f32 %v83_v37, 0.0  ;;  %v102_v40 = vmax.f32 %v97_v38, 0.0 }
  0x9a   :  { %105 = vst [vmem:[%s221_s3] sm:$0xff] %v101_v39 }
  0x9b   :  { %106 = vst [vmem:[%s221_s3 + $0x8] sm:$0xff] %v102_v40 }
  0x9d   :  { %v84_v42 = vpop.f32.mrf.mxu0  ;;  %v98_v43 = vpop.f32.mrf.mxu1 }
  0x9e   :  { %v85_v44 = vadd.f32 %v84_v42, %v55_v41  ;;  %v99_v45 = vadd.f32 %v98_v43, %v55_v41 }
  0xa0   :  { %v103_v46 = vmax.f32 %v85_v44, 0.0  ;;  %v104_v47 = vmax.f32 %v99_v45, 0.0 }
  0xa2   :  { %107 = vst [vmem:[%s221_s3 + $0x10] sm:$0xff] %v103_v46 }
  0xa3   :  { %108 = vst [vmem:[%s221_s3 + $0x18] sm:$0xff] %v104_v47 }

// kernel: cae_lstm_encoder.6
= control target key start
LH: loop header
LB: loop body
LE: loop exit
PB: predicated region body
PF: predicated region fallthrough
CT: control target
= control target key end

     0   :  { %s356_s1 = inlined_call_operand.vmem [shape: bf16[256,128], index: 1, kind: input, shape index: {}]   ;;  %s357_s2 = inlined_call_operand.vmem [shape: f32[1,128], index: 2, kind: input, shape index: {}]   ;;  %s358_s0 = inlined_call_operand.vmem [shape: f32[16,256], index: 0, kind: input, shape index: {}]   ;;  %s359_s3 = inlined_call_operand.vmem [shape: f32[16,128], index: 3, kind: output, shape index: {}]  }
   0x1   :  { %v257_v0 = vld [vmem:[%s356_s1 + $0x38] sm:$0xff]  ;;  %v256_v2 = vld [vmem:[%s356_s1 + $0x30] sm:$0xff]  ;;  %v255_v4 = vld [vmem:[%s356_s1 + $0x28] sm:$0xff] }
   0x2   :  { %v265_v1 = vld [vmem:[%s356_s1 + $0x78] sm:$0xff]  ;;  %152 = vmatpush.bf16.msra.mxu0 %v257_v0  ;;  %v264_v3 = vld [vmem:[%s356_s1 + $0x70] sm:$0xff]  ;;  %v263_v5 = vld [vmem:[%s356_s1 + $0x68] sm:$0xff] }
   0x3   :  { %166 = vmatpush.bf16.msra.mxu1 %v265_v1  ;;  %v254_v6 = vld [vmem:[%s356_s1 + $0x20] sm:$0xff]  ;;  %v253_v8 = vld [vmem:[%s356_s1 + $0x18] sm:$0xff]  ;;  %v252_v10 = vld [vmem:[%s356_s1 + $0x10] sm:$0xff] }
   0x4   :  { %v262_v7 = vld [vmem:[%s356_s1 + $0x60] sm:$0xff]  ;;  %v261_v9 = vld [vmem:[%s356_s1 + $0x58] sm:$0xff]  ;;  %v260_v11 = vld [vmem:[%s356_s1 + $0x50] sm:$0xff] }
   0x5   :  { %v251_v12 = vld [vmem:[%s356_s1 + $0x8] sm:$0xff]  ;;  %v250_v14 = vld [vmem:[%s356_s1] sm:$0xff]  ;;  %v16_v17 = vld [vmem:[%s358_s0 + $0x10] sm:$0xff] }
   0x6   :  { %153 = vmatpush.bf16.msra.mxu0 %v256_v2  ;;  %v259_v13 = vld [vmem:[%s356_s1 + $0x48] sm:$0xff]  ;;  %v258_v15 = vld [vmem:[%s356_s1 + $0x40] sm:$0xff]  ;;  %v17_v19 = vld [vmem:[%s358_s0 + $0x18] sm:$0xff] }
   0x7   :  { %167 = vmatpush.bf16.msra.mxu1 %v264_v3  ;;  %v14_v16 = vld [vmem:[%s358_s0] sm:$0xff]  ;;  %v15_v18 = vld [vmem:[%s358_s0 + $0x8] sm:$0xff] }
   0x8   :  { %v18_v20 = vpack.c.bf16 %v16_v17, %v14_v16  ;;  %v19_v21 = vpack.c.bf16 %v17_v19, %v15_v18  ;;  %v266_v22 = vld [vmem:[%s357_s2] ss:$0 sm:$0xff] }
   0xa   :  { %154 = vmatpush.bf16.msra.mxu0 %v255_v4 }
   0xb   :  { %168 = vmatpush.bf16.msra.mxu1 %v263_v5 }
   0xe   :  { %155 = vmatpush.bf16.msra.mxu0 %v254_v6 }
   0xf   :  { %169 = vmatpush.bf16.msra.mxu1 %v262_v7 }
  0x12   :  { %156 = vmatpush.bf16.msra.mxu0 %v253_v8 }
  0x13   :  { %170 = vmatpush.bf16.msra.mxu1 %v261_v9 }
  0x16   :  { %157 = vmatpush.bf16.msra.mxu0 %v252_v10 }
  0x17   :  { %171 = vmatpush.bf16.msra.mxu1 %v260_v11 }
  0x1a   :  { %158 = vmatpush.bf16.msra.mxu0 %v251_v12 }
  0x1b   :  { %172 = vmatpush.bf16.msra.mxu1 %v259_v13 }
  0x1e   :  { %159 = vmatpush.bf16.msra.mxu0 %v250_v14 }
  0x1f   :  { %173 = vmatpush.bf16.msra.mxu1 %v258_v15 }
  0x21   :  { %160 = vmatmul.bf16.vlgmr.msra.gmra.mxu0 %v18_v20 }
  0x22   :  { %174 = vmatmul.bf16.vlgmr.msra.gmra.mxu1 %v19_v21 }
  0x9e   :  { %v161_v23 = vpop.f32.mrf.mxu0 }
  0x9f   :  { %v175_v24 = vpop.f32.mrf.mxu1  ;;  %v162_v25 = vadd.f32 %v266_v22, %v161_v23 }
  0xa1   :  { %v176_v26 = vadd.f32 %v175_v24, %v162_v25 }
  0xa3   :  { %180 = vst [vmem:[%s359_s3] sm:$0xff] %v176_v26 }
  0xa6   :  { %v163_v27 = vpop.f32.mrf.mxu0 }
  0xa7   :  { %v164_v28 = vadd.f32 %v266_v22, %v163_v27  ;;  %v177_v29 = vpop.f32.mrf.mxu1 }
  0xa9   :  { %v178_v30 = vadd.f32 %v177_v29, %v164_v28 }
  0xab   :  { %181 = vst [vmem:[%s359_s3 + $0x8] sm:$0xff] %v178_v30 }

// kernel: cae_lstm_encoder.7
= control target key start
LH: loop header
LB: loop body
LE: loop exit
PB: predicated region body
PF: predicated region fallthrough
CT: control target
= control target key end

     0   :  { %11 = vsyncpa [#allocation5], 0  ;;  %s799_s0 = inlined_call_operand.vmem [shape: f32[8,4,2,32], index: 0, kind: input, shape index: {}]   ;;  %s800_s1 = inlined_call_operand.vmem [shape: bf16[4,32,32], index: 1, kind: input, shape index: {}]   ;;  %s801_s2 = inlined_call_operand.vmem [shape: f32[2,32], index: 2, kind: input, shape index: {}, may-alias: {2,3}]   ;;  %s802_s3 = inlined_call_operand.vmem [shape: f32[2,32], index: 3, kind: input, shape index: {}, may-alias: {2,3}]   ;;  %s803_s4 = inlined_call_operand.hbm [shape: f32[2,32], index: 4, kind: output, shape index: {0}]   ;;  %s804_s5 = inlined_call_operand.hbm [shape: f32[2,32], index: 5, kind: output, shape index: {1}]  }
   0x1   :  { %12 = vsyncpa [#allocation7], 0  ;;  %s720_s18 = smov 0  }
   0x2 LB: > { %s726_s19 = sadd.s32 4294967295, %s686_s18   ;;  %p504_p0 = scmp.ge.s32.totalorder %s686_s18, 1  ;;  %s686_s18 = sphi %s720_s18, %s18_s18  }
   0x3   : > { %p182_p1 = scmp.lt.s32.totalorder %s686_s18, 9 }
   0x5   : > { %p183_p2 = pnand %p504_p0, %p182_p1 }
   0x6   : > { %p205_p3 = scmp.lt.s32.totalorder (!%p183_p2), %s726_s19, 7  ;;  %p507_p4 = scmp.ne.s32.totalorder (!%p183_p2), %s726_s19, 0 }
   0x7   : > { %186 = sbr.rel (%p183_p2) target bundleno = 212 (0xd4), region = 36 }
   0xc   : > { %s206_s20 = scalar_select %p205_p3, %s726_s19, 7 }
   0xd   : > { %214 = sbr.rel (%p507_p4) target bundleno = 21 (0x15), region = 40 }
   0xe   : > { %s569_s21 = sshll.u32 %s206_s20, 3 }
   0xf   : > { %s735_s24 = scalar_lea.vmem %s799_s0, %s569_s21 }
  0x12   : > { %v215_v0 = vld [vmem:[%s801_s2] sm:$0x3]  ;;  %vm216_vm0 = vcmask 254976  }
  0x13   : > { %v218_v1 = vld [vmem:[%s802_s3] sm:$0x3]  ;;  %217 = vst.msk [vmem:[#allocation2] sm:$0x3] %vm216_vm0, %v215_v0 }
  0x14   : > { %219 = vst.msk [vmem:[#allocation3] sm:$0x3] %vm216_vm0, %v218_v1 }
  0x15 PF: > { %v571_v2 = vld [vmem:[%s800_s1 + $0x8] sm:$0xff]  ;;  %v573_v3 = vld [vmem:[%s800_s1 + $0x18] sm:$0xff]  ;;  %v570_v5 = vld [vmem:[%s800_s1] sm:$0xff]  ;;  %vm240_vm1 = vcmask 261120   ;;  %vm420_vm10 = vcmask 254976   ;;  %p562_p5 = scmp.ne.s32.totalorder %s726_s19, 7 }
  0x16   : > { %v577_v4 = vld [vmem:[%s800_s1 + $0x38] sm:$0xff]  ;;  %250 = vmatpush.bf16.msra.mxu0 %v571_v2  ;;  %283 = vmatpush.bf16.msra.mxu1 %v573_v3  ;;  %v572_v6 = vld [vmem:[%s800_s1 + $0x10] sm:$0xff]  ;;  %v575_v8 = vld [vmem:[%s800_s1 + $0x28] sm:$0xff] }
  0x17   : > { %349 = vmatpush.bf16.msra.mxu3 %v577_v4  ;;  %v576_v9 = vld [vmem:[%s800_s1 + $0x30] sm:$0xff]  ;;  %316 = vmatpush.bf16.msra.mxu2 %v575_v8  ;;  %v574_v10 = vld [vmem:[%s800_s1 + $0x20] sm:$0xff] }
  0x18   : > { %v223_v12 = vld [vmem:[%s735_s24] sm:$0x3]  ;;  %v517_v13 = vld [vmem:[%s735_s24 + $0x2] sm:$0x3]  ;;  %v545_v20 = vld [vmem:[%s735_s24 + $0x6] sm:$0x3] }
  0x19   : > { %v531_v31 = vld [vmem:[%s735_s24 + $0x4] sm:$0x3] }
  0x1a   : > { %v220_v7 = vld [vmem:[#allocation2] sm:$0x3]  ;;  %251 = vmatpush.bf16.msra.mxu0 %v570_v5  ;;  %284 = vmatpush.bf16.msra.mxu1 %v572_v6 }
  0x1b   : > { %v222_v11 = vpack.c.bf16 %v220_v7, %v220_v7  ;;  %350 = vmatpush.bf16.msra.mxu3 %v576_v9  ;;  %317 = vmatpush.bf16.msra.mxu2 %v574_v10  ;;  %v221_v56 = vld [vmem:[#allocation3] sm:$0x3] }
  0x1d   : > { %516 = vmatmul.msk.bf16.vlgmr.msra.gmra.mxu0 %vm240_vm1, %v222_v11  ;;  %530 = vmatmul.msk.bf16.vlgmr.msra.gmra.mxu1 %vm240_vm1, %v222_v11 }
  0x1e   : > { %558 = vmatmul.msk.bf16.vlgmr.msra.gmra.mxu3 %vm240_vm1, %v222_v11  ;;  %544 = vmatmul.msk.bf16.vlgmr.msra.gmra.mxu2 %vm240_vm1, %v222_v11 }
  0x9a   : > { %v253_v14 = vpop.f32.mrf.mxu0  ;;  %v286_v15 = vpop.f32.mrf.mxu1 }
  0x9b   : > { %v257_v16 = vadd.f32 %v253_v14, %v223_v12  ;;  %v290_v17 = vadd.f32 %v517_v13, %v286_v15 }
  0x9d   : > { %v559_v18 = vmul.f32 -1.442695, %v257_v16  ;;  %v560_v19 = vmul.f32 -1.442695, %v290_v17 }
  0x9f   : > { %600 = vpow2.f32 %v559_v18 }
  0xa0   : > { %602 = vpow2.f32 %v560_v19 }
  0xa1   : > { %v352_v21 = vpop.f32.mrf.mxu3  ;;  %v319_v25 = vpop.f32.mrf.mxu2 }
  0xa2   : > { %v356_v22 = vadd.f32 %v545_v20, %v352_v21  ;;  %v255_v23 = vpop.f32.mrf.mxu0  ;;  %v288_v24 = vpop.f32.mrf.mxu1  ;;  %v323_v35 = vadd.f32 %v531_v31, %v319_v25 }
  0xa4   : > { %v561_v26 = vmul.f32 -1.442695, %v356_v22 }
  0xa5   : > { %v601_v27 = vpop.eup %600 }
  0xa6   : > { %v603_v28 = vpop.eup %602  ;;  %v360_v29 = vadd.f32 1.0, %v601_v27  ;;  %604 = vpow2.f32 %v561_v26 }
  0xa7   : > { %v379_v30 = vadd.f32 1.0, %v603_v28 }
  0xa8   : > { %606 = vrcp.f32 %v360_v29  ;;  %v372_v43 = vand.u32 2147483648, %v360_v29  ;;  %v370_v46 = vand.u32 2147483647, %v360_v29  ;;  %vm366_vm4 = vweird.f32 %v360_v29 }
  0xa9   : > { %608 = vrcp.f32 %v379_v30  ;;  %v354_v32 = vpop.f32.mrf.mxu3  ;;  %v321_v33 = vpop.f32.mrf.mxu2  ;;  %v391_v44 = vand.u32 2147483648, %v379_v30  ;;  %v389_v48 = vand.u32 2147483647, %v379_v30  ;;  %vm385_vm5 = vweird.f32 %v379_v30 }
  0xaa   : > { %v373_v53 = vor.u32 1.1754944e-38, %v372_v43  ;;  %vm371_vm8 = vcmp.eq.f32.partialorder %v370_v46, 8.507059e+37 }
  0xab   : > { %v392_v55 = vor.u32 1.1754944e-38, %v391_v44  ;;  %vm390_vm9 = vcmp.eq.f32.partialorder %v389_v48, 8.507059e+37 }
  0xac   : > { %v605_v34 = vpop.eup %604 }
  0xad   : > { %v399_v36 = vadd.f32 1.0, %v605_v34 }
  0xae   : > { %v607_v37 = vpop.eup %606 }
  0xaf   : > { %v609_v38 = vpop.eup %608  ;;  %v362_v39 = vmul.f32 %v607_v37, %v360_v29  ;;  %610 = vrcp.f32 %v399_v36  ;;  %vm367_vm2 = vweird.f32 %v607_v37  ;;  %v411_v3 = vand.u32 2147483648, %v399_v36 }
  0xb0   : > { %v381_v40 = vmul.f32 %v609_v38, %v379_v30  ;;  %612 = vtanh.f32 %v323_v35  ;;  %vm386_vm3 = vweird.f32 %v609_v38  ;;  %vm368_vm6 = vmor %vm366_vm4, %vm367_vm2  ;;  %vm405_vm12 = vweird.f32 %v399_v36 }
  0xb1   : > { %v363_v41 = vsub.f32 1.0, %v362_v39  ;;  %vm387_vm7 = vmor %vm385_vm5, %vm386_vm3  ;;  %v409_v4 = vand.u32 2147483647, %v399_v36  ;;  %v412_v6 = vor.u32 1.1754944e-38, %v411_v3 }
  0xb2   : > { %v382_v42 = vsub.f32 1.0, %v381_v40 }
  0xb3   : > { %v364_v45 = vmul.f32 %v607_v37, %v363_v41  ;;  %vm410_vm14 = vcmp.eq.f32.partialorder %v409_v4, 8.507059e+37 }
  0xb4   : > { %v383_v47 = vmul.f32 %v609_v38, %v382_v42 }
  0xb5   : > { %v611_v49 = vpop.eup %610  ;;  %v365_v50 = vadd.f32 %v607_v37, %v364_v45 }
  0xb6   : > { %v613_v51 = vpop.eup %612  ;;  %v401_v52 = vmul.f32 %v611_v49, %v399_v36  ;;  %v384_v54 = vadd.f32 %v609_v38, %v383_v47  ;;  %vm406_vm11 = vweird.f32 %v611_v49 }
  0xb7   : > { %v369_v57 = vsel %vm368_vm6, %v607_v37, %v365_v50  ;;  %vm407_vm13 = vmor %vm405_vm12, %vm406_vm11 }
  0xb8   : > { %v402_v58 = vsub.f32 1.0, %v401_v52  ;;  %v374_v59 = vsel %vm371_vm8, %v373_v53, %v369_v57  ;;  %v388_v60 = vsel %vm387_vm7, %v609_v38, %v384_v54 }
  0xb9   : > { %v393_v61 = vsel %vm390_vm9, %v392_v55, %v388_v60  ;;  %v416_v62 = vmul.f32 %v613_v51, %v374_v59 }
  0xba   : > { %v403_v63 = vmul.f32 %v611_v49, %v402_v58  ;;  %v415_v0 = vmul.f32 %v393_v61, %v221_v56 }
  0xbc   : > { %v417_v1 = vadd.f32 %v416_v62, %v415_v0  ;;  %v404_v2 = vadd.f32 %v611_v49, %v403_v63 }
  0xbe   : > { %614 = vtanh.f32 %v417_v1  ;;  %422 = vst.msk [vmem:[#allocation3] sm:$0x3] %vm420_vm10, %v417_v1  ;;  %v408_v5 = vsel %vm407_vm13, %v611_v49, %v404_v2 }
  0xbf   : > { %v413_v8 = vsel %vm410_vm14, %v412_v6, %v408_v5 }
  0xc3   : > { %426 = sbr.rel (%p562_p5) target bundleno = 202 (0xca), region = 44 }
  0xc4   : > { %v615_v7 = vpop.eup %614 }
  0xc5   : > { %v419_v9 = vmul.f32 %v615_v7, %v413_v8 }
  0xc7   : > { %421 = vst.msk [vmem:[#allocation2] sm:$0x3] %vm420_vm10, %v419_v9 }
  0xc8   : > { %427 = vst.msk [vmem:[#allocation4] sm:$0x3] %vm420_vm10, %v419_v9 }
  0xc9   : > { %428 = vst.msk [vmem:[#allocation6] sm:$0x3] %vm420_vm10, %v417_v1 }
  0xca PF: > { %p586_p6 = scmp.eq.s32.totalorder %s726_s19, 7  ;;  %s688_s22 = smov [#allocation4]  }
  0xcb   : > { %s435_s23 = sshll.u32 %s688_s22, 4  ;;  %s437_s26 = sshll.u32 %s803_s4, 4  ;;  %s436_s23 = int_to_ptr.vmem [resolvable:$true] %s435_s23  ;;  %s438_s26 = int_to_ptr.hbm [resolvable:$true] %s437_s26 }
  0xcc   : > { %579 = dma.vmem_to_hbm [thread:$0]  (%p586_p6), %s436_s23, 32, %s438_s26, [#allocation5]  }
  0xcd   : > { %s449_s29 = sshll.u32 %s804_s5, 4  ;;  %s689_s30 = smov [#allocation6]   ;;  %s450_s29 = int_to_ptr.hbm [resolvable:$true] %s449_s29 }
  0xce   : > { %s447_s6 = sshll.u32 %s689_s30, 4  ;;  %s448_s6 = int_to_ptr.vmem [resolvable:$true] %s447_s6 }
  0xcf   : > { %581 = dma.vmem_to_hbm [thread:$0]  (%p586_p6), %s448_s6, 32, %s450_s29, [#allocation7]  }
  0xd0   : > { %677 = dma.done.wait (%p586_p6), [#allocation5], 32  }
  0xd1   : > { %679 = vsyncadd (%p586_p6), [#allocation5], 4294967264 }
  0xd2   : > { %681 = dma.done.wait (%p586_p6), [#allocation7], 32  }
  0xd3   : > { %683 = vsyncadd (%p586_p6), [#allocation7], 4294967264 }
  0xd4 PF: > { %s18_s18 = sadd.s32 1, %s686_s18  }
  0xd5   : > { %p15_p7 = scmp.ge.s32.totalorder %s18_s18, 10  }
  0xd7   :  { %17 = sbr.rel (!%p15_p7) target bundleno = 2 (0x2), region = 85 }
  0xdc   :  { %468 = vsyncpa [#allocation5], 1 }
  0xdd   :  { %470 = vsyncpa [#allocation5 + $0x1], 1 }
  0xde   :  { %471 = vsyncpa [#allocation7], 1 }

</bundles_post_ra>
